<compile_context>
chip_gen: v7x
topology: tpu7x:2x2x1
jax: 0.10.0
libtpu: 0.0.40
codegen_flags: <defaults>
</compile_context>

<pallas_src>
import functools

import numpy as np
import jax
import jax.numpy as jnp
from jax.experimental import pallas as pl
from jax.experimental.pallas import tpu as pltpu


def _cdiv(a, b):
    return -(-a // b)


def _round_up(x, m):
    return ((x + m - 1) // m) * m


def _padded_bytes(rows, cols, itemsize):
    """Size of a (rows, cols) VMEM buffer after (sublane, 128-lane) padding."""
    sublane = 8 * max(1, 4 // max(1, itemsize))
    return _round_up(rows, sublane) * _round_up(cols, 128) * itemsize


def _vmem_budget_bytes():
    # Generation-aware budget: ~3/4 of physical VMEM (v5e/v6e: 128 MiB,
    # v7x: 64 MiB); conservative 48 MiB if the query is unavailable.
    try:
        cap = getattr(pltpu.get_tpu_info(), "vmem_capacity_bytes", None)
        if cap:
            return int(cap) * 3 // 4
    except Exception:
        pass
    return 48 << 20


@functools.lru_cache(maxsize=None)
def _expansion_matrix(n, d):
    # E[m, n*D + d] = 1 iff m == n, so (x @ E)[b, n*D + d] = x[b, n].
    # 0/1 entries => the MXU expansion is exact regardless of matmul passes.
    # Built once per (n, d) on the host and cached (no per-call kron/HBM op).
    # TODO(synk): on v7x, if vst / MXU-pop binds, fold weights into E
    # (E_w[n, n*D+d] = w[n, d]) to drop the in-kernel vmul and the w operand.
    e = np.zeros((n, n * d), dtype=np.float32)
    for i in range(n):
        e[i, i * d:(i + 1) * d] = 1.0
    return jnp.asarray(e)


def numerical_embedder_kernel(x_ref, e_ref, w_ref, b_ref, o_ref):
    # x_ref: (tb, N)   batch tile
    # e_ref: (N, N*D)  resident block-diagonal 0/1 expansion matrix
    # w_ref: (1, N*D)  resident flattened weights
    # b_ref: (1, N*D)  resident flattened biases
    # o_ref: (tb, N*D) lane-dense output tile
    x = x_ref[...].astype(jnp.float32)
    # Expand on the MXU: (tb, N) @ (N, N*D) -> (tb, N*D); avoids a
    # sublane-padded 3-D broadcast intermediate on the VPU.
    xe = jnp.dot(x, e_ref[...], preferred_element_type=jnp.float32)
    out = xe * w_ref[...].astype(jnp.float32) + b_ref[...].astype(jnp.float32)
    o_ref[...] = out.astype(o_ref.dtype)


def _pick_batch_tile(B, ND, out_bytes, *, align, target_tile_bytes,
                     min_grid_steps=2):
    row_bytes = max(1, ND * out_bytes)
    # Largest tile whose (single-buffered) output stays under the target.
    tb = max(1, target_tile_bytes // row_bytes)
    # >= 2 grid steps when possible: enough to overlap writeback of tile i-1
    # with compute of tile i, and to split the batch across v7x's two cores.
    tb = min(tb, _cdiv(B, min_grid_steps))
    tb = max(align, (tb // align) * align)
    tb = min(tb, _round_up(B, align))
    return tb


def numerical_embedder(x, weights, biases, *, batch_tile=None):
    B, N = x.shape
    N_w, D = weights.shape
    assert N == N_w and biases.shape == (N, D)

    out_dtype = jnp.result_type(x.dtype, weights.dtype, biases.dtype)
    ND = N * D
    out_bytes = jnp.dtype(out_dtype).itemsize
    x_bytes = jnp.dtype(x.dtype).itemsize
    p_bytes = jnp.dtype(weights.dtype).itemsize

    # Sublane alignment from the *stricter* of the x / out dtypes
    # (8 rows for 32-bit, 16 for 16-bit, 32 for 8-bit).
    align = 8 * max(1, 4 // max(1, min(x_bytes, out_bytes)))

    budget = _vmem_budget_bytes()
    # v5e/v6e (bigger VMEM, slower HBM) can afford larger output tiles.
    target_tile_bytes = (8 << 20) if budget >= (80 << 20) else (4 << 20)

    def vmem_needed(tb, resident_bufs):
        return (2 * _padded_bytes(tb, N, x_bytes)            # x tiles
                + 2 * _padded_bytes(tb, ND, out_bytes)       # out tiles
                + resident_bufs * _padded_bytes(N, ND, 4)    # E
                + 2 * resident_bufs * _padded_bytes(1, ND, p_bytes))  # w, b

    if batch_tile is None:
        tb = _pick_batch_tile(B, ND, out_bytes, align=align,
                              target_tile_bytes=target_tile_bytes)
    else:
        tb = max(align, _round_up(batch_tile, align))

    # Shrink tb rather than clamping the VMEM limit below actual need
    # (conservatively budgeting double-buffered residents so the no-Buffered
    # fallback also fits).
    while tb > align and vmem_needed(tb, 2) > budget:
        tb = max(align, ((tb // 2) // align) * align)
    if vmem_needed(tb, 2) > budget:
        # TODO(synk): tile the feature axis (block-diagonal E slices of shape
        # (Nblk, Nblk*D)) so resident VMEM scales as Nblk^2*D instead of N^2*D.
        raise NotImplementedError(
            "NumericalEmbedder: N*D too large for the resident-E design on "
            "this TPU's VMEM; feature-axis tiling not implemented.")

    # Nudge odd step counts (>1) to even so both v7x TensorCores get equal work.
    steps = _cdiv(B, tb)
    if steps > 1 and steps % 2 == 1:
        tb_alt = max(align, _round_up(_cdiv(B, steps + 1), align))
        if _cdiv(B, tb_alt) % 2 == 0:
            tb = tb_alt
    grid_steps = _cdiv(B, tb)

    expand = _expansion_matrix(N, D)          # cached 0/1 constant
    w_flat = weights.reshape(1, ND)
    b_flat = biases.reshape(1, ND)

    vmem_limit = int(min(budget,
                         max(2 * vmem_needed(tb, 2) + (2 << 20), 16 << 20)))

    cost = pl.CostEstimate(
        flops=2 * B * N * ND,                 # the MXU expansion actually done
        transcendentals=0,
        bytes_accessed=(B * N * x_bytes + B * ND * out_bytes
                        + N * ND * 4 + 2 * ND * p_bytes),
    )

    def build(resident_kwargs):
        in_specs = [
            # x: tiled over batch (ragged last block handled by Pallas).
            pl.BlockSpec((tb, N), lambda i: (i, 0)),
            # Grid-invariant residents: constant index_map, optionally
            # single-buffered (the second buffer is pure VMEM waste).
            pl.BlockSpec((N, ND), lambda i: (0, 0), **resident_kwargs),
            pl.BlockSpec((1, ND), lambda i: (0, 0), **resident_kwargs),
            pl.BlockSpec((1, ND), lambda i: (0, 0), **resident_kwargs),
        ]
        return pl.pallas_call(
            numerical_embedder_kernel,
            out_shape=jax.ShapeDtypeStruct((B, ND), out_dtype),
            grid=(grid_steps,),
            in_specs=in_specs,
            out_specs=pl.BlockSpec((tb, ND), lambda i: (i, 0)),
            compiler_params=pltpu.CompilerParams(
                dimension_semantics=("parallel",),
                vmem_limit_bytes=vmem_limit),
            cost_estimate=cost,
        )

    try:
        out_flat = build(dict(pipeline_mode=pl.Buffered(1)))(
            x, expand, w_flat, b_flat)
    except Exception:
        # Fallback for JAX versions where single-buffering via
        # pipeline_mode=pl.Buffered(1) is unsupported; identical semantics.
        out_flat = build({})(x, expand, w_flat, b_flat)

    # (B, N*D) -> (B, N, D) is a no-op at the HBM level (contiguous).
    return out_flat.reshape(B, N, D)


def numerical_embedder_ref(x, weights, biases):
    return x[:, :, None] * weights[None, :, :] + biases[None, :, :]


if __name__ == "__main__":
    # Deterministic synthetic parameters (module __init__: randn(n, dim) twice).
    dim = 32                    # embedding dim
    num_numerical_types = 4     # n
    batch = 8                   # b

    key = jax.random.PRNGKey(0)
    k_x, k_w, k_b = jax.random.split(key, 3)
    x = jax.random.normal(k_x, (batch, num_numerical_types), dtype=jnp.float32)
    weights = jax.random.normal(k_w, (num_numerical_types, dim),
                                dtype=jnp.float32)
    biases = jax.random.normal(k_b, (num_numerical_types, dim),
                               dtype=jnp.float32)

    out = jax.block_until_ready(numerical_embedder(x, weights, biases))
    expected = numerical_embedder_ref(x, weights, biases)
    assert out.shape == (batch, num_numerical_types, dim)
    assert jnp.allclose(out, expected, atol=1e-5, rtol=1e-5)

    # Ragged multi-step batch: exercises the clipped partial last block
    # (no pad-then-slice epilogue anymore).
    batch2 = 37
    x2 = jax.random.normal(k_x, (batch2, num_numerical_types),
                           dtype=jnp.float32)
    out2 = jax.block_until_ready(
        numerical_embedder(x2, weights, biases, batch_tile=8))
    assert jnp.allclose(out2, numerical_embedder_ref(x2, weights, biases),
                        atol=1e-5, rtol=1e-5)

    print("KERNEL_OK")
</pallas_src>

<mosaic_0001>
module attributes {stable_mosaic.version = 11 : i64} {
  func.func @numerical_embedder_kernel(%arg0: i32, %arg1: memref<8x4xf32, #tpu.memory_space<vmem>>, %arg2: memref<4x128xf32, #tpu.memory_space<vmem>>, %arg3: memref<1x128xf32, #tpu.memory_space<vmem>>, %arg4: memref<1x128xf32, #tpu.memory_space<vmem>>, %arg5: memref<8x128xf32, #tpu.memory_space<vmem>>) attributes {dimension_semantics = [#tpu.dimension_semantics<parallel>], iteration_bounds = array<i64: 1>, scalar_prefetch = 0 : i64, scratch_operands = 0 : i64, tpu.core_type = #tpu.core_type<tc>, window_params = [{transform_indices = @transform_0, window_bounds = array<i64: 8, 4>}, {pipeline_mode = #tpu.pipeline_mode<synchronous>, transform_indices = @transform_1, window_bounds = array<i64: 4, 128>}, {pipeline_mode = #tpu.pipeline_mode<synchronous>, transform_indices = @transform_2, window_bounds = array<i64: 1, 128>}, {pipeline_mode = #tpu.pipeline_mode<synchronous>, transform_indices = @transform_3, window_bounds = array<i64: 1, 128>}, {transform_indices = @transform_4, window_bounds = array<i64: 8, 128>}]} {
    %c0 = arith.constant 0 : index
    %c0_0 = arith.constant 0 : index
    %0 = vector.load %arg1[%c0, %c0_0] : memref<8x4xf32, #tpu.memory_space<vmem>>, vector<8x4xf32>
    %c0_1 = arith.constant 0 : index
    %c0_2 = arith.constant 0 : index
    %1 = vector.load %arg2[%c0_1, %c0_2] : memref<4x128xf32, #tpu.memory_space<vmem>>, vector<4x128xf32>
    %cst = arith.constant dense<0.000000e+00> : vector<8x128xf32>
    %2 = tpu.matmul %0, %1, %cst {dimension_numbers = #tpu.dot_dimension_numbers<[1], [0], [0], [1], [0, 0, 1, 1], [], []>} : vector<8x4xf32>, vector<4x128xf32>, vector<8x128xf32> -> vector<8x128xf32>
    %c0_3 = arith.constant 0 : index
    %c0_4 = arith.constant 0 : index
    %3 = vector.load %arg3[%c0_3, %c0_4] : memref<1x128xf32, #tpu.memory_space<vmem>>, vector<1x128xf32>
    %4 = vector.broadcast %3 : vector<1x128xf32> to vector<8x128xf32>
    %5 = arith.mulf %2, %4 : vector<8x128xf32>
    %c0_5 = arith.constant 0 : index
    %c0_6 = arith.constant 0 : index
    %6 = vector.load %arg4[%c0_5, %c0_6] : memref<1x128xf32, #tpu.memory_space<vmem>>, vector<1x128xf32>
    %7 = vector.broadcast %6 : vector<1x128xf32> to vector<8x128xf32>
    %8 = arith.addf %5, %7 : vector<8x128xf32>
    %c0_7 = arith.constant 0 : index
    %c0_8 = arith.constant 0 : index
    %9 = vector.load %arg5[%c0_7, %c0_8] : memref<8x128xf32, #tpu.memory_space<vmem>>, vector<8x128xf32>
    tpu.vector_store %arg5[%c0_7, %c0_8], %8 {strides = array<i32>} : memref<8x128xf32, #tpu.memory_space<vmem>>, vector<8x128xf32>,
    return
  }
  func.func @transform_0(%arg0: i32) -> (i32, i32) {
    %c0_i32 = arith.constant 0 : i32
    %c0_i32_0 = arith.constant 0 : i32
    return %arg0, %c0_i32 : i32, i32
  }
  func.func @transform_1(%arg0: i32) -> (i32, i32) {
    %c0_i32 = arith.constant 0 : i32
    %c0_i32_0 = arith.constant 0 : i32
    %c0_i32_1 = arith.constant 0 : i32
    return %c0_i32, %c0_i32_0 : i32, i32
  }
  func.func @transform_2(%arg0: i32) -> (i32, i32) {
    %c0_i32 = arith.constant 0 : i32
    %c0_i32_0 = arith.constant 0 : i32
    %c0_i32_1 = arith.constant 0 : i32
    return %c0_i32, %c0_i32_0 : i32, i32
  }
  func.func @transform_3(%arg0: i32) -> (i32, i32) {
    %c0_i32 = arith.constant 0 : i32
    %c0_i32_0 = arith.constant 0 : i32
    %c0_i32_1 = arith.constant 0 : i32
    return %c0_i32, %c0_i32_0 : i32, i32
  }
  func.func @transform_4(%arg0: i32) -> (i32, i32) {
    %c0_i32 = arith.constant 0 : i32
    %c0_i32_0 = arith.constant 0 : i32
    return %arg0, %c0_i32 : i32, i32
  }
}

module attributes {stable_mosaic.version = 11 : i64} {
  func.func @numerical_embedder_kernel(%arg0: i32, %arg1: memref<8x4xf32, #tpu.memory_space<vmem>>, %arg2: memref<4x128xf32, #tpu.memory_space<vmem>>, %arg3: memref<1x128xf32, #tpu.memory_space<vmem>>, %arg4: memref<1x128xf32, #tpu.memory_space<vmem>>, %arg5: memref<8x128xf32, #tpu.memory_space<vmem>>) attributes {dimension_semantics = [#tpu.dimension_semantics<parallel>], iteration_bounds = array<i64: 1>, scalar_prefetch = 0 : i64, scratch_operands = 0 : i64, tpu.core_type = #tpu.core_type<tc>, window_params = [{transform_indices = @transform_0, window_bounds = array<i64: 8, 4>}, {pipeline_mode = #tpu.pipeline_mode<synchronous>, transform_indices = @transform_1, window_bounds = array<i64: 4, 128>}, {pipeline_mode = #tpu.pipeline_mode<synchronous>, transform_indices = @transform_2, window_bounds = array<i64: 1, 128>}, {pipeline_mode = #tpu.pipeline_mode<synchronous>, transform_indices = @transform_3, window_bounds = array<i64: 1, 128>}, {transform_indices = @transform_4, window_bounds = array<i64: 8, 128>}]} {
    %c0 = arith.constant 0 : index
    %c0_0 = arith.constant 0 : index
    %0 = vector.load %arg1[%c0, %c0_0] : memref<8x4xf32, #tpu.memory_space<vmem>>, vector<8x4xf32>
    %c0_1 = arith.constant 0 : index
    %c0_2 = arith.constant 0 : index
    %1 = vector.load %arg2[%c0_1, %c0_2] : memref<4x128xf32, #tpu.memory_space<vmem>>, vector<4x128xf32>
    %cst = arith.constant dense<0.000000e+00> : vector<8x128xf32>
    %2 = tpu.matmul %0, %1, %cst {dimension_numbers = #tpu.dot_dimension_numbers<[1], [0], [0], [1], [0, 0, 1, 1], [], []>} : vector<8x4xf32>, vector<4x128xf32>, vector<8x128xf32> -> vector<8x128xf32>
    %c0_3 = arith.constant 0 : index
    %c0_4 = arith.constant 0 : index
    %3 = vector.load %arg3[%c0_3, %c0_4] : memref<1x128xf32, #tpu.memory_space<vmem>>, vector<1x128xf32>
    %4 = vector.broadcast %3 : vector<1x128xf32> to vector<8x128xf32>
    %5 = arith.mulf %2, %4 : vector<8x128xf32>
    %c0_5 = arith.constant 0 : index
    %c0_6 = arith.constant 0 : index
    %6 = vector.load %arg4[%c0_5, %c0_6] : memref<1x128xf32, #tpu.memory_space<vmem>>, vector<1x128xf32>
    %7 = vector.broadcast %6 : vector<1x128xf32> to vector<8x128xf32>
    %8 = arith.addf %5, %7 : vector<8x128xf32>
    %c0_7 = arith.constant 0 : index
    %c0_8 = arith.constant 0 : index
    %9 = vector.load %arg5[%c0_7, %c0_8] : memref<8x128xf32, #tpu.memory_space<vmem>>, vector<8x128xf32>
    tpu.vector_store %arg5[%c0_7, %c0_8], %8 {strides = array<i32>} : memref<8x128xf32, #tpu.memory_space<vmem>>, vector<8x128xf32>,
    return
  }
  func.func @transform_0(%arg0: i32) -> (i32, i32) {
    %c0_i32 = arith.constant 0 : i32
    %c0_i32_0 = arith.constant 0 : i32
    return %arg0, %c0_i32 : i32, i32
  }
  func.func @transform_1(%arg0: i32) -> (i32, i32) {
    %c0_i32 = arith.constant 0 : i32
    %c0_i32_0 = arith.constant 0 : i32
    %c0_i32_1 = arith.constant 0 : i32
    return %c0_i32, %c0_i32_0 : i32, i32
  }
  func.func @transform_2(%arg0: i32) -> (i32, i32) {
    %c0_i32 = arith.constant 0 : i32
    %c0_i32_0 = arith.constant 0 : i32
    %c0_i32_1 = arith.constant 0 : i32
    return %c0_i32, %c0_i32_0 : i32, i32
  }
  func.func @transform_3(%arg0: i32) -> (i32, i32) {
    %c0_i32 = arith.constant 0 : i32
    %c0_i32_0 = arith.constant 0 : i32
    %c0_i32_1 = arith.constant 0 : i32
    return %c0_i32, %c0_i32_0 : i32, i32
  }
  func.func @transform_4(%arg0: i32) -> (i32, i32) {
    %c0_i32 = arith.constant 0 : i32
    %c0_i32_0 = arith.constant 0 : i32
    return %arg0, %c0_i32 : i32, i32
  }
}

</mosaic_0001>

<bundles_post_ra>
// kernel: tpu_custom_call.1
= control target key start
LH: loop header
LB: loop body
LE: loop exit
PB: predicated region body
PF: predicated region fallthrough
CT: control target
= control target key end

     0   :  { %vm24_vm0 = vcmask 1043456   ;;  %v167_v2 = vmov 0.0   ;;  %vm168_vm1 = vmmov 0   ;;  %vm20_vm2 = vcmask 31744   ;;  %s219_s0 = inlined_call_operand.vmem [shape: f32[8,4], index: 0, kind: input, shape index: {}]   ;;  %s220_s1 = inlined_call_operand.vmem [shape: f32[4,128], index: 1, kind: input, shape index: {}]   ;;  %s221_s2 = inlined_call_operand.vmem [shape: f32[1,128], index: 2, kind: input, shape index: {}]   ;;  %s222_s3 = inlined_call_operand.vmem [shape: f32[1,128], index: 3, kind: input, shape index: {}]   ;;  %s223_s4 = inlined_call_operand.hbm [shape: f32[8,128], index: 4, kind: output, shape index: {}]  }
   0x1   :  { %v19_v0 = vld [vmem:[%s220_s1] sm:$0xf]  ;;  %135 = vmatprep.subr.mxu0 %v167_v2  ;;  %137 = vmatprep.mubr.msk.f32.mxu0 %vm168_vm1, %v167_v2 }
   0x2   :  { %v18_v1 = vld [vmem:[%s219_s0] sm:$0xff] }
   0x3   :  { %9 = vsyncpa [#allocation3], 0  ;;  %136 = vmatpush3.msk.msra.mxu0 %vm24_vm0, %v19_v0  ;;  %v131_v3 = vld [vmem:[%s221_s2] ss:$0 sm:$0xff]  ;;  %s169_s22 = smov [#allocation2]  }
   0x4   :  { %138 = vmatmul.mubr.msk.f32.vlgmr.msra.gmra.mrb[0].mxu0 %vm20_vm2, %v18_v1  ;;  %v132_v5 = vld [vmem:[%s222_s3] ss:$0 sm:$0xff]  ;;  %s121_s23 = sshll.u32 %s169_s22, 4  ;;  %s122_s23 = int_to_ptr.vmem [resolvable:$true] %s121_s23 }
   0x5   :  { %s143_s0 = scalar_lea.vmem %s122_s23, 128  ;;  %p148_p1 = scmp.lt.s32.totalorder %s122_s23, %s122_s23 }
   0x6   :  { %p144_p0 = scmp.ne.s32.totalorder %s122_s23, %s143_s0  ;;  %p149_p2 = scmp.lt.s32.totalorder %s143_s0, %s143_s0 }
   0x8   :  { %p150_p3 = por %p149_p2, %p148_p1 }
   0xa   :  { %p151_p4 = pnand %p150_p3, %p144_p0 }
  0xd7   :  { %v94_v4 = vpop.f32.mrb[0].mxu0 }
  0xd8   :  { %v105_v6 = vmul.f32 %v131_v3, %v94_v4  ;;  %v139_v7 = vpop.f32.mrb[1].mxu0 }
  0xda   :  { %v113_v8 = vadd.f32 %v132_v5, %v105_v6 }
  0xdc   :  { %114 = vst [vmem:[#allocation2] sm:$0xff] %v113_v8 }
  0xdd   :  { %154 = shalt.err (!%p151_p4)
}
  0xde   :  { %s155_s25 = scalar_lea.hbm %s223_s4, 128 }
  0xdf   :  { %p156_p5 = scmp.ne.s32.totalorder %s223_s4, %s155_s25  ;;  %p159_p6 = scmp.lt.u32.totalorder %s155_s25, %s223_s4 }
  0xe1   :  { %p161_p7 = pnand %p159_p6, %p156_p5 }
  0xe3   :  { %164 = shalt.err (!%p161_p7)
}
  0xe4   :  { %124 = dma.vmem_to_hbm [thread:$0]  %s122_s23, 128, %s223_s4, [#allocation3]  }
  0xe5   :  { %165 = dma.done.wait [#allocation3], 128  }
  0xe6   :  { %166 = vsyncadd [#allocation3], 4294967168 }
  0xe7   :  { %128 = vsyncpa [#allocation3], 1 }

// kernel: tpu_custom_call.1
= control target key start
LH: loop header
LB: loop body
LE: loop exit
PB: predicated region body
PF: predicated region fallthrough
CT: control target
= control target key end

     0   :  { %vm24_vm0 = vcmask 1043456   ;;  %v167_v2 = vmov 0.0   ;;  %vm168_vm1 = vmmov 0   ;;  %vm20_vm2 = vcmask 31744   ;;  %s219_s0 = inlined_call_operand.vmem [shape: f32[8,4], index: 0, kind: input, shape index: {}]   ;;  %s220_s1 = inlined_call_operand.vmem [shape: f32[4,128], index: 1, kind: input, shape index: {}]   ;;  %s221_s2 = inlined_call_operand.vmem [shape: f32[1,128], index: 2, kind: input, shape index: {}]   ;;  %s222_s3 = inlined_call_operand.vmem [shape: f32[1,128], index: 3, kind: input, shape index: {}]   ;;  %s223_s4 = inlined_call_operand.hbm [shape: f32[8,128], index: 4, kind: output, shape index: {}]  }
   0x1   :  { %v19_v0 = vld [vmem:[%s220_s1] sm:$0xf]  ;;  %135 = vmatprep.subr.mxu0 %v167_v2  ;;  %137 = vmatprep.mubr.msk.f32.mxu0 %vm168_vm1, %v167_v2 }
   0x2   :  { %v18_v1 = vld [vmem:[%s219_s0] sm:$0xff] }
   0x3   :  { %9 = vsyncpa [#allocation3], 0  ;;  %136 = vmatpush3.msk.msra.mxu0 %vm24_vm0, %v19_v0  ;;  %v131_v3 = vld [vmem:[%s221_s2] ss:$0 sm:$0xff]  ;;  %s169_s22 = smov [#allocation2]  }
   0x4   :  { %138 = vmatmul.mubr.msk.f32.vlgmr.msra.gmra.mrb[0].mxu0 %vm20_vm2, %v18_v1  ;;  %v132_v5 = vld [vmem:[%s222_s3] ss:$0 sm:$0xff]  ;;  %s121_s23 = sshll.u32 %s169_s22, 4  ;;  %s122_s23 = int_to_ptr.vmem [resolvable:$true] %s121_s23 }
   0x5   :  { %s143_s0 = scalar_lea.vmem %s122_s23, 128  ;;  %p148_p1 = scmp.lt.s32.totalorder %s122_s23, %s122_s23 }
   0x6   :  { %p144_p0 = scmp.ne.s32.totalorder %s122_s23, %s143_s0  ;;  %p149_p2 = scmp.lt.s32.totalorder %s143_s0, %s143_s0 }
   0x8   :  { %p150_p3 = por %p149_p2, %p148_p1 }
   0xa   :  { %p151_p4 = pnand %p150_p3, %p144_p0 }
  0xd7   :  { %v94_v4 = vpop.f32.mrb[0].mxu0 }
  0xd8   :  { %v105_v6 = vmul.f32 %v131_v3, %v94_v4  ;;  %v139_v7 = vpop.f32.mrb[1].mxu0 }
  0xda   :  { %v113_v8 = vadd.f32 %v132_v5, %v105_v6 }
  0xdc   :  { %114 = vst [vmem:[#allocation2] sm:$0xff] %v113_v8 }
  0xdd   :  { %154 = shalt.err (!%p151_p4)
}
  0xde   :  { %s155_s25 = scalar_lea.hbm %s223_s4, 128 }
  0xdf   :  { %p156_p5 = scmp.ne.s32.totalorder %s223_s4, %s155_s25  ;;  %p159_p6 = scmp.lt.u32.totalorder %s155_s25, %s223_s4 }
  0xe1   :  { %p161_p7 = pnand %p159_p6, %p156_p5 }
  0xe3   :  { %164 = shalt.err (!%p161_p7)
}
  0xe4   :  { %124 = dma.vmem_to_hbm [thread:$0]  %s122_s23, 128, %s223_s4, [#allocation3]  }
  0xe5   :  { %165 = dma.done.wait [#allocation3], 128  }
  0xe6   :  { %166 = vsyncadd [#allocation3], 4294967168 }
  0xe7   :  { %128 = vsyncpa [#allocation3], 1 }

</bundles_post_ra>
